<compile_context>
chip_gen: v5e
topology: v5e:2x2
jax: 0.10.0
libtpu: 0.0.40
codegen_flags: <defaults>
</compile_context>

<pallas_src>
import functools

import jax
import jax.numpy as jnp
from jax import lax
from jax.experimental import pallas as pl
from jax.experimental.pallas import tpu as pltpu


def _attention_kernel(x_ref, wqkv_ref, bqkv_ref, wproj_ref, bproj_ref, o_ref,
                      qkv_ref, ctx_ref, *, num_heads, head_dim):
    """One grid step = one batch element: fused QKV, per-head softmax(q k^T) v, out-proj."""
    C = num_heads * head_dim

    x = x_ref[0]                                                    # (N, C) bf16

    # --- Batched QKV projection: one lane-dense (N, C) @ (C, 3C) MXU matmul. --------------
    # Softmax scale is already folded into the q columns of Wqkv / bqkv (wrapper).
    qkv = jnp.dot(x, wqkv_ref[...], preferred_element_type=jnp.float32) + bqkv_ref[...]
    qkv_ref[...] = qkv.astype(qkv_ref.dtype)        # single f32 -> bf16 cast point

    # --- Per-head attention.  H is small & static -> unrolled loop with static slices. ----
    for h in range(num_heads):
        lo = h * head_dim
        hi = lo + head_dim
        q = qkv_ref[:, lo:hi]                                       # (N, Dh) bf16
        k = qkv_ref[:, C + lo:C + hi]                               # (N, Dh) bf16
        v = qkv_ref[:, 2 * C + lo:2 * C + hi]                       # (N, Dh) bf16

        # Scores: contract Dh of q with Dh of k (implicit kT; cheap at Dh<=128, small N —
        # only worth pre-transposing in a flash-tiled large-N variant).
        s = lax.dot_general(q, k, dimension_numbers=(((1,), (1,)), ((), ())),
                            preferred_element_type=jnp.float32)     # (N, N) f32

        # Numerically stable softmax in f32 (mask=None path; attn_drop p=0 -> identity).
        s = s - jnp.max(s, axis=-1, keepdims=True)
        s = jnp.exp(s)
        s = s * pl.reciprocal(jnp.sum(s, axis=-1, keepdims=True), approx=True)

        # Per-head context, written into its column slice of the (N, C) concat scratch.
        ctx = jnp.dot(s.astype(v.dtype), v, preferred_element_type=jnp.float32)  # (N, Dh)
        ctx_ref[:, lo:hi] = ctx.astype(ctx_ref.dtype)

    # --- Deferred output projection: one full-depth (N, C) @ (C, C) matmul + bias. --------
    out = jnp.dot(ctx_ref[...], wproj_ref[...], preferred_element_type=jnp.float32)
    o_ref[0] = (out + bproj_ref[...]).astype(o_ref.dtype)           # proj_drop p=0 -> identity


def _vmem_physical_bytes():
    try:
        return int(pltpu.get_tpu_info().vmem_capacity_bytes)
    except Exception:
        return 64 * 1024 * 1024     # conservative default (v7x per-core VMEM)


def attention_pallas(x, wqkv, bqkv, wproj, bproj, num_heads, compute_dtype=jnp.bfloat16):
    """Forward of the ViT Attention module (key_padding_mask=None, dropout p=0).

    x:     (B, N, C)
    wqkv:  (C, 3C)  stored as (in_features, out_features)  [= PyTorch qkv.weight.T]
    bqkv:  (3C,)
    wproj: (C, C)   stored as (in_features, out_features)  [= PyTorch proj.weight.T]
    bproj: (C,)
    """
    B, N, C = x.shape
    H = num_heads
    Dh = C // H
    assert H * Dh == C, "num_heads must divide C"
    scale = Dh ** (-0.5)
    out_dtype = x.dtype

    # ---- weight-only layout plumbing (no activation transposes) --------------------------
    # qkv output-column order is [q|k|v] x [head] x [dim] (matches reshape(B,N,3,H,Dh)).
    # Fold the softmax scale into the q columns so the kernel never scales the (N,N) scores.
    col_scale = jnp.concatenate([jnp.full((C,), scale, jnp.float32),
                                 jnp.ones((2 * C,), jnp.float32)])
    wqkv_c = (wqkv.astype(jnp.float32) * col_scale).astype(compute_dtype)    # (C, 3C)
    bqkv_c = (bqkv.astype(jnp.float32) * col_scale).reshape(1, 3 * C)        # (1, 3C) f32
    wproj_c = wproj.astype(compute_dtype)                                    # (C, C)
    bproj_c = bproj.astype(jnp.float32).reshape(1, C)                        # (1, C)  f32
    xc = x.astype(compute_dtype)                                             # halves x DMA

    # ---- generation-aware VMEM budget (headroom below physical per-core VMEM) ------------
    esz = jnp.dtype(compute_dtype).itemsize
    osz = jnp.dtype(out_dtype).itemsize
    per_step = (2 * N * C * esz                      # x block (double-buffered)
                + 2 * N * C * osz                    # output block
                + 2 * C * 3 * C * esz                # Wqkv (resident; 2 buffers budgeted)
                + 2 * C * C * esz                    # Wproj
                + 2 * 4 * (3 * C + C)                # biases (f32)
                + N * 3 * C * esz                    # qkv scratch
                + N * C * esz                        # ctx concat scratch
                + 2 * N * N * 4                      # score / softmax tile (f32)
                + 4 * N * Dh * 4)                    # per-head temporaries
    cap = max(_vmem_physical_bytes() - 8 * 1024 * 1024, 32 * 1024 * 1024)
    vmem_limit = int(min(cap, max(32 * 1024 * 1024, 2 * per_step)))

    kernel = functools.partial(_attention_kernel, num_heads=H, head_dim=Dh)

    return pl.pallas_call(
        kernel,
        out_shape=jax.ShapeDtypeStruct((B, N, C), out_dtype),
        grid_spec=pltpu.PrefetchScalarGridSpec(
            num_scalar_prefetch=0,
            grid=(B,),
            in_specs=[
                pl.BlockSpec((1, N, C), lambda b: (b, 0, 0)),      # x
                pl.BlockSpec((C, 3 * C), lambda b: (0, 0)),        # Wqkv (resident, scale folded)
                pl.BlockSpec((1, 3 * C), lambda b: (0, 0)),        # bqkv (scale folded)
                pl.BlockSpec((C, C), lambda b: (0, 0)),            # Wproj (resident)
                pl.BlockSpec((1, C), lambda b: (0, 0)),            # bproj
            ],
            out_specs=pl.BlockSpec((1, N, C), lambda b: (b, 0, 0)),
            scratch_shapes=[
                pltpu.VMEM((N, 3 * C), compute_dtype),             # qkv (bf16, post-bias)
                pltpu.VMEM((N, C), compute_dtype),                 # per-head ctx concat
            ],
        ),
        compiler_params=pltpu.CompilerParams(
            dimension_semantics=("parallel",),
            vmem_limit_bytes=vmem_limit,
        ),
    )(xc, wqkv_c, bqkv_c, wproj_c, bproj_c)


def attention_ref(x, wqkv, bqkv, wproj, bproj, num_heads):
    """Pure-JAX f32 reference mirroring the PyTorch forward (mask=None, dropout p=0)."""
    B, N, C = x.shape
    Dh = C // num_heads
    scale = Dh ** (-0.5)
    qkv = x @ wqkv + bqkv                                          # (B, N, 3C)
    qkv = qkv.reshape(B, N, 3, num_heads, Dh).transpose(2, 0, 3, 1, 4)
    q, k, v = qkv[0], qkv[1], qkv[2]                               # (B, H, N, Dh)
    attn = jnp.einsum('bhnd,bhmd->bhnm', q, k) * scale
    attn = jax.nn.softmax(attn, axis=-1)
    out = jnp.einsum('bhnm,bhmd->bhnd', attn, v)
    out = out.transpose(0, 2, 1, 3).reshape(B, N, C)
    return out @ wproj + bproj


if __name__ == "__main__":
    B, N, C = 2, 8, 32
    num_heads = 8

    key = jax.random.PRNGKey(0)
    kx, kw1, kb1, kw2, kb2 = jax.random.split(key, 5)

    x = jax.random.normal(kx, (B, N, C), dtype=jnp.float32)
    # Parameters follow nn.Linear(dim, dim*3) / nn.Linear(dim, dim), stored as (in, out).
    wqkv = jax.random.normal(kw1, (C, 3 * C), dtype=jnp.float32) * 0.05
    bqkv = jax.random.normal(kb1, (3 * C,), dtype=jnp.float32) * 0.05
    wproj = jax.random.normal(kw2, (C, C), dtype=jnp.float32) * 0.05
    bproj = jax.random.normal(kb2, (C,), dtype=jnp.float32) * 0.05

    out = attention_pallas(x, wqkv, bqkv, wproj, bproj, num_heads)
    out = jax.block_until_ready(out)

    ref = attention_ref(x, wqkv, bqkv, wproj, bproj, num_heads)
    assert out.shape == ref.shape and out.dtype == ref.dtype
    # bf16 MXU inputs + approx reciprocal -> compare against the f32 reference with a
    # tolerance appropriate for bf16 matmul inputs.
    assert jnp.allclose(out, ref, atol=2e-2, rtol=2e-2), "mismatch vs reference"

    print("KERNEL_OK")
</pallas_src>

<mosaic_0001>
module attributes {stable_mosaic.version = 11 : i64} {
  func.func @_attention_kernel(%arg0: i32, %arg1: memref<1x8x32xbf16, #tpu.memory_space<vmem>>, %arg2: memref<32x96xbf16, #tpu.memory_space<vmem>>, %arg3: memref<1x96xf32, #tpu.memory_space<vmem>>, %arg4: memref<32x32xbf16, #tpu.memory_space<vmem>>, %arg5: memref<1x32xf32, #tpu.memory_space<vmem>>, %arg6: memref<1x8x32xf32, #tpu.memory_space<vmem>>, %arg7: memref<8x96xbf16, #tpu.memory_space<vmem>>, %arg8: memref<8x32xbf16, #tpu.memory_space<vmem>>) attributes {dimension_semantics = [#tpu.dimension_semantics<parallel>], iteration_bounds = array<i64: 2>, scalar_prefetch = 0 : i64, scratch_operands = 2 : i64, tpu.core_type = #tpu.core_type<tc>, window_params = [{transform_indices = @transform_0, window_bounds = array<i64: 1, 8, 32>}, {pipeline_mode = #tpu.pipeline_mode<synchronous>, transform_indices = @transform_1, window_bounds = array<i64: 32, 96>}, {pipeline_mode = #tpu.pipeline_mode<synchronous>, transform_indices = @transform_2, window_bounds = array<i64: 1, 96>}, {pipeline_mode = #tpu.pipeline_mode<synchronous>, transform_indices = @transform_3, window_bounds = array<i64: 32, 32>}, {pipeline_mode = #tpu.pipeline_mode<synchronous>, transform_indices = @transform_4, window_bounds = array<i64: 1, 32>}, {transform_indices = @transform_5, window_bounds = array<i64: 1, 8, 32>}]} {
    %c0 = arith.constant 0 : index
    %c0_0 = arith.constant 0 : index
    %c0_1 = arith.constant 0 : index
    %0 = vector.load %arg1[%c0, %c0_0, %c0_1] : memref<1x8x32xbf16, #tpu.memory_space<vmem>>, vector<1x8x32xbf16>
    %1 = vector.shape_cast %0 : vector<1x8x32xbf16> to vector<8x32xbf16>
    %c0_2 = arith.constant 0 : index
    %c0_3 = arith.constant 0 : index
    %2 = vector.load %arg2[%c0_2, %c0_3] : memref<32x96xbf16, #tpu.memory_space<vmem>>, vector<32x96xbf16>
    %cst = arith.constant dense<0.000000e+00> : vector<8x96xf32>
    %3 = tpu.matmul %1, %2, %cst {dimension_numbers = #tpu.dot_dimension_numbers<[1], [0], [0], [1], [0, 0, 1, 1], [], []>} : vector<8x32xbf16>, vector<32x96xbf16>, vector<8x96xf32> -> vector<8x96xf32>
    %c0_4 = arith.constant 0 : index
    %c0_5 = arith.constant 0 : index
    %4 = vector.load %arg3[%c0_4, %c0_5] : memref<1x96xf32, #tpu.memory_space<vmem>>, vector<1x96xf32>
    %5 = vector.broadcast %4 : vector<1x96xf32> to vector<8x96xf32>
    %6 = arith.addf %3, %5 : vector<8x96xf32>
    %7 = arith.truncf %6 : vector<8x96xf32> to vector<8x96xbf16>
    %c0_6 = arith.constant 0 : index
    %c0_7 = arith.constant 0 : index
    %8 = vector.load %arg7[%c0_6, %c0_7] : memref<8x96xbf16, #tpu.memory_space<vmem>>, vector<8x96xbf16>
    tpu.vector_store %arg7[%c0_6, %c0_7], %7 {strides = array<i32>} : memref<8x96xbf16, #tpu.memory_space<vmem>>, vector<8x96xbf16>,
    %c0_8 = arith.constant 0 : index
    %c0_9 = arith.constant 0 : index
    %9 = vector.load %arg7[%c0_8, %c0_9] : memref<8x96xbf16, #tpu.memory_space<vmem>>, vector<8x4xbf16>
    %c0_10 = arith.constant 0 : index
    %c32 = arith.constant 32 : index
    %10 = vector.load %arg7[%c0_10, %c32] : memref<8x96xbf16, #tpu.memory_space<vmem>>, vector<8x4xbf16>
    %c0_11 = arith.constant 0 : index
    %c64 = arith.constant 64 : index
    %11 = vector.load %arg7[%c0_11, %c64] : memref<8x96xbf16, #tpu.memory_space<vmem>>, vector<8x4xbf16>
    %cst_12 = arith.constant dense<0.000000e+00> : vector<8x8xf32>
    %12 = tpu.matmul %9, %10, %cst_12 {dimension_numbers = #tpu.dot_dimension_numbers<[1], [1], [0], [0], [0, 0, 1, 0], [], []>} : vector<8x4xbf16>, vector<8x4xbf16>, vector<8x8xf32> -> vector<8x8xf32>
    %cst_13 = arith.constant dense<0xFF800000> : vector<8xf32>
    %13 = vector.multi_reduction <maximumf>, %12, %cst_13 [1] : vector<8x8xf32> to vector<8xf32>
    %14 = vector.shape_cast %13 : vector<8xf32> to vector<8x1xf32>
    %15 = vector.broadcast %14 : vector<8x1xf32> to vector<8x8xf32>
    %16 = arith.subf %12, %15 : vector<8x8xf32>
    %17 = math.exp %16 : vector<8x8xf32>
    %cst_14 = arith.constant dense<0.000000e+00> : vector<8xf32>
    %18 = vector.multi_reduction <add>, %17, %cst_14 [1] : vector<8x8xf32> to vector<8xf32>
    %19 = vector.shape_cast %18 : vector<8xf32> to vector<8x1xf32>
    %20 = tpu.reciprocal %19 {approx = true} : vector<8x1xf32> -> vector<8x1xf32>
    %21 = vector.broadcast %20 : vector<8x1xf32> to vector<8x8xf32>
    %22 = arith.mulf %17, %21 : vector<8x8xf32>
    %23 = arith.truncf %22 : vector<8x8xf32> to vector<8x8xbf16>
    %cst_15 = arith.constant dense<0.000000e+00> : vector<8x4xf32>
    %24 = tpu.matmul %23, %11, %cst_15 {dimension_numbers = #tpu.dot_dimension_numbers<[1], [0], [0], [1], [0, 0, 1, 1], [], []>} : vector<8x8xbf16>, vector<8x4xbf16>, vector<8x4xf32> -> vector<8x4xf32>
    %25 = arith.truncf %24 : vector<8x4xf32> to vector<8x4xbf16>
    %c0_16 = arith.constant 0 : index
    %c0_17 = arith.constant 0 : index
    %26 = vector.load %arg8[%c0_16, %c0_17] : memref<8x32xbf16, #tpu.memory_space<vmem>>, vector<8x4xbf16>
    tpu.vector_store %arg8[%c0_16, %c0_17], %25 {strides = array<i32>} : memref<8x32xbf16, #tpu.memory_space<vmem>>, vector<8x4xbf16>,
    %c0_18 = arith.constant 0 : index
    %c4 = arith.constant 4 : index
    %27 = vector.load %arg7[%c0_18, %c4] : memref<8x96xbf16, #tpu.memory_space<vmem>>, vector<8x4xbf16>
    %c0_19 = arith.constant 0 : index
    %c36 = arith.constant 36 : index
    %28 = vector.load %arg7[%c0_19, %c36] : memref<8x96xbf16, #tpu.memory_space<vmem>>, vector<8x4xbf16>
    %c0_20 = arith.constant 0 : index
    %c68 = arith.constant 68 : index
    %29 = vector.load %arg7[%c0_20, %c68] : memref<8x96xbf16, #tpu.memory_space<vmem>>, vector<8x4xbf16>
    %cst_21 = arith.constant dense<0.000000e+00> : vector<8x8xf32>
    %30 = tpu.matmul %27, %28, %cst_21 {dimension_numbers = #tpu.dot_dimension_numbers<[1], [1], [0], [0], [0, 0, 1, 0], [], []>} : vector<8x4xbf16>, vector<8x4xbf16>, vector<8x8xf32> -> vector<8x8xf32>
    %cst_22 = arith.constant dense<0xFF800000> : vector<8xf32>
    %31 = vector.multi_reduction <maximumf>, %30, %cst_22 [1] : vector<8x8xf32> to vector<8xf32>
    %32 = vector.shape_cast %31 : vector<8xf32> to vector<8x1xf32>
    %33 = vector.broadcast %32 : vector<8x1xf32> to vector<8x8xf32>
    %34 = arith.subf %30, %33 : vector<8x8xf32>
    %35 = math.exp %34 : vector<8x8xf32>
    %cst_23 = arith.constant dense<0.000000e+00> : vector<8xf32>
    %36 = vector.multi_reduction <add>, %35, %cst_23 [1] : vector<8x8xf32> to vector<8xf32>
    %37 = vector.shape_cast %36 : vector<8xf32> to vector<8x1xf32>
    %38 = tpu.reciprocal %37 {approx = true} : vector<8x1xf32> -> vector<8x1xf32>
    %39 = vector.broadcast %38 : vector<8x1xf32> to vector<8x8xf32>
    %40 = arith.mulf %35, %39 : vector<8x8xf32>
    %41 = arith.truncf %40 : vector<8x8xf32> to vector<8x8xbf16>
    %cst_24 = arith.constant dense<0.000000e+00> : vector<8x4xf32>
    %42 = tpu.matmul %41, %29, %cst_24 {dimension_numbers = #tpu.dot_dimension_numbers<[1], [0], [0], [1], [0, 0, 1, 1], [], []>} : vector<8x8xbf16>, vector<8x4xbf16>, vector<8x4xf32> -> vector<8x4xf32>
    %43 = arith.truncf %42 : vector<8x4xf32> to vector<8x4xbf16>
    %c0_25 = arith.constant 0 : index
    %c4_26 = arith.constant 4 : index
    %44 = vector.load %arg8[%c0_25, %c4_26] : memref<8x32xbf16, #tpu.memory_space<vmem>>, vector<8x4xbf16>
    tpu.vector_store %arg8[%c0_25, %c4_26], %43 {strides = array<i32>} : memref<8x32xbf16, #tpu.memory_space<vmem>>, vector<8x4xbf16>,
    %c0_27 = arith.constant 0 : index
    %c8 = arith.constant 8 : index
    %45 = vector.load %arg7[%c0_27, %c8] : memref<8x96xbf16, #tpu.memory_space<vmem>>, vector<8x4xbf16>
    %c0_28 = arith.constant 0 : index
    %c40 = arith.constant 40 : index
    %46 = vector.load %arg7[%c0_28, %c40] : memref<8x96xbf16, #tpu.memory_space<vmem>>, vector<8x4xbf16>
    %c0_29 = arith.constant 0 : index
    %c72 = arith.constant 72 : index
    %47 = vector.load %arg7[%c0_29, %c72] : memref<8x96xbf16, #tpu.memory_space<vmem>>, vector<8x4xbf16>
    %cst_30 = arith.constant dense<0.000000e+00> : vector<8x8xf32>
    %48 = tpu.matmul %45, %46, %cst_30 {dimension_numbers = #tpu.dot_dimension_numbers<[1], [1], [0], [0], [0, 0, 1, 0], [], []>} : vector<8x4xbf16>, vector<8x4xbf16>, vector<8x8xf32> -> vector<8x8xf32>
    %cst_31 = arith.constant dense<0xFF800000> : vector<8xf32>
    %49 = vector.multi_reduction <maximumf>, %48, %cst_31 [1] : vector<8x8xf32> to vector<8xf32>
    %50 = vector.shape_cast %49 : vector<8xf32> to vector<8x1xf32>
    %51 = vector.broadcast %50 : vector<8x1xf32> to vector<8x8xf32>
    %52 = arith.subf %48, %51 : vector<8x8xf32>
    %53 = math.exp %52 : vector<8x8xf32>
    %cst_32 = arith.constant dense<0.000000e+00> : vector<8xf32>
    %54 = vector.multi_reduction <add>, %53, %cst_32 [1] : vector<8x8xf32> to vector<8xf32>
    %55 = vector.shape_cast %54 : vector<8xf32> to vector<8x1xf32>
    %56 = tpu.reciprocal %55 {approx = true} : vector<8x1xf32> -> vector<8x1xf32>
    %57 = vector.broadcast %56 : vector<8x1xf32> to vector<8x8xf32>
    %58 = arith.mulf %53, %57 : vector<8x8xf32>
    %59 = arith.truncf %58 : vector<8x8xf32> to vector<8x8xbf16>
    %cst_33 = arith.constant dense<0.000000e+00> : vector<8x4xf32>
    %60 = tpu.matmul %59, %47, %cst_33 {dimension_numbers = #tpu.dot_dimension_numbers<[1], [0], [0], [1], [0, 0, 1, 1], [], []>} : vector<8x8xbf16>, vector<8x4xbf16>, vector<8x4xf32> -> vector<8x4xf32>
    %61 = arith.truncf %60 : vector<8x4xf32> to vector<8x4xbf16>
    %c0_34 = arith.constant 0 : index
    %c8_35 = arith.constant 8 : index
    %62 = vector.load %arg8[%c0_34, %c8_35] : memref<8x32xbf16, #tpu.memory_space<vmem>>, vector<8x4xbf16>
    tpu.vector_store %arg8[%c0_34, %c8_35], %61 {strides = array<i32>} : memref<8x32xbf16, #tpu.memory_space<vmem>>, vector<8x4xbf16>,
    %c0_36 = arith.constant 0 : index
    %c12 = arith.constant 12 : index
    %63 = vector.load %arg7[%c0_36, %c12] : memref<8x96xbf16, #tpu.memory_space<vmem>>, vector<8x4xbf16>
    %c0_37 = arith.constant 0 : index
    %c44 = arith.constant 44 : index
    %64 = vector.load %arg7[%c0_37, %c44] : memref<8x96xbf16, #tpu.memory_space<vmem>>, vector<8x4xbf16>
    %c0_38 = arith.constant 0 : index
    %c76 = arith.constant 76 : index
    %65 = vector.load %arg7[%c0_38, %c76] : memref<8x96xbf16, #tpu.memory_space<vmem>>, vector<8x4xbf16>
    %cst_39 = arith.constant dense<0.000000e+00> : vector<8x8xf32>
    %66 = tpu.matmul %63, %64, %cst_39 {dimension_numbers = #tpu.dot_dimension_numbers<[1], [1], [0], [0], [0, 0, 1, 0], [], []>} : vector<8x4xbf16>, vector<8x4xbf16>, vector<8x8xf32> -> vector<8x8xf32>
    %cst_40 = arith.constant dense<0xFF800000> : vector<8xf32>
    %67 = vector.multi_reduction <maximumf>, %66, %cst_40 [1] : vector<8x8xf32> to vector<8xf32>
    %68 = vector.shape_cast %67 : vector<8xf32> to vector<8x1xf32>
    %69 = vector.broadcast %68 : vector<8x1xf32> to vector<8x8xf32>
    %70 = arith.subf %66, %69 : vector<8x8xf32>
    %71 = math.exp %70 : vector<8x8xf32>
    %cst_41 = arith.constant dense<0.000000e+00> : vector<8xf32>
    %72 = vector.multi_reduction <add>, %71, %cst_41 [1] : vector<8x8xf32> to vector<8xf32>
    %73 = vector.shape_cast %72 : vector<8xf32> to vector<8x1xf32>
    %74 = tpu.reciprocal %73 {approx = true} : vector<8x1xf32> -> vector<8x1xf32>
    %75 = vector.broadcast %74 : vector<8x1xf32> to vector<8x8xf32>
    %76 = arith.mulf %71, %75 : vector<8x8xf32>
    %77 = arith.truncf %76 : vector<8x8xf32> to vector<8x8xbf16>
    %cst_42 = arith.constant dense<0.000000e+00> : vector<8x4xf32>
    %78 = tpu.matmul %77, %65, %cst_42 {dimension_numbers = #tpu.dot_dimension_numbers<[1], [0], [0], [1], [0, 0, 1, 1], [], []>} : vector<8x8xbf16>, vector<8x4xbf16>, vector<8x4xf32> -> vector<8x4xf32>
    %79 = arith.truncf %78 : vector<8x4xf32> to vector<8x4xbf16>
    %c0_43 = arith.constant 0 : index
    %c12_44 = arith.constant 12 : index
    %80 = vector.load %arg8[%c0_43, %c12_44] : memref<8x32xbf16, #tpu.memory_space<vmem>>, vector<8x4xbf16>
    tpu.vector_store %arg8[%c0_43, %c12_44], %79 {strides = array<i32>} : memref<8x32xbf16, #tpu.memory_space<vmem>>, vector<8x4xbf16>,
    %c0_45 = arith.constant 0 : index
    %c16 = arith.constant 16 : index
    %81 = vector.load %arg7[%c0_45, %c16] : memref<8x96xbf16, #tpu.memory_space<vmem>>, vector<8x4xbf16>
    %c0_46 = arith.constant 0 : index
    %c48 = arith.constant 48 : index
    %82 = vector.load %arg7[%c0_46, %c48] : memref<8x96xbf16, #tpu.memory_space<vmem>>, vector<8x4xbf16>
    %c0_47 = arith.constant 0 : index
    %c80 = arith.constant 80 : index
    %83 = vector.load %arg7[%c0_47, %c80] : memref<8x96xbf16, #tpu.memory_space<vmem>>, vector<8x4xbf16>
    %cst_48 = arith.constant dense<0.000000e+00> : vector<8x8xf32>
    %84 = tpu.matmul %81, %82, %cst_48 {dimension_numbers = #tpu.dot_dimension_numbers<[1], [1], [0], [0], [0, 0, 1, 0], [], []>} : vector<8x4xbf16>, vector<8x4xbf16>, vector<8x8xf32> -> vector<8x8xf32>
    %cst_49 = arith.constant dense<0xFF800000> : vector<8xf32>
    %85 = vector.multi_reduction <maximumf>, %84, %cst_49 [1] : vector<8x8xf32> to vector<8xf32>
    %86 = vector.shape_cast %85 : vector<8xf32> to vector<8x1xf32>
    %87 = vector.broadcast %86 : vector<8x1xf32> to vector<8x8xf32>
    %88 = arith.subf %84, %87 : vector<8x8xf32>
    %89 = math.exp %88 : vector<8x8xf32>
    %cst_50 = arith.constant dense<0.000000e+00> : vector<8xf32>
    %90 = vector.multi_reduction <add>, %89, %cst_50 [1] : vector<8x8xf32> to vector<8xf32>
    %91 = vector.shape_cast %90 : vector<8xf32> to vector<8x1xf32>
    %92 = tpu.reciprocal %91 {approx = true} : vector<8x1xf32> -> vector<8x1xf32>
    %93 = vector.broadcast %92 : vector<8x1xf32> to vector<8x8xf32>
    %94 = arith.mulf %89, %93 : vector<8x8xf32>
    %95 = arith.truncf %94 : vector<8x8xf32> to vector<8x8xbf16>
    %cst_51 = arith.constant dense<0.000000e+00> : vector<8x4xf32>
    %96 = tpu.matmul %95, %83, %cst_51 {dimension_numbers = #tpu.dot_dimension_numbers<[1], [0], [0], [1], [0, 0, 1, 1], [], []>} : vector<8x8xbf16>, vector<8x4xbf16>, vector<8x4xf32> -> vector<8x4xf32>
    %97 = arith.truncf %96 : vector<8x4xf32> to vector<8x4xbf16>
    %c0_52 = arith.constant 0 : index
    %c16_53 = arith.constant 16 : index
    %98 = vector.load %arg8[%c0_52, %c16_53] : memref<8x32xbf16, #tpu.memory_space<vmem>>, vector<8x4xbf16>
    tpu.vector_store %arg8[%c0_52, %c16_53], %97 {strides = array<i32>} : memref<8x32xbf16, #tpu.memory_space<vmem>>, vector<8x4xbf16>,
    %c0_54 = arith.constant 0 : index
    %c20 = arith.constant 20 : index
    %99 = vector.load %arg7[%c0_54, %c20] : memref<8x96xbf16, #tpu.memory_space<vmem>>, vector<8x4xbf16>
    %c0_55 = arith.constant 0 : index
    %c52 = arith.constant 52 : index
    %100 = vector.load %arg7[%c0_55, %c52] : memref<8x96xbf16, #tpu.memory_space<vmem>>, vector<8x4xbf16>
    %c0_56 = arith.constant 0 : index
    %c84 = arith.constant 84 : index
    %101 = vector.load %arg7[%c0_56, %c84] : memref<8x96xbf16, #tpu.memory_space<vmem>>, vector<8x4xbf16>
    %cst_57 = arith.constant dense<0.000000e+00> : vector<8x8xf32>
    %102 = tpu.matmul %99, %100, %cst_57 {dimension_numbers = #tpu.dot_dimension_numbers<[1], [1], [0], [0], [0, 0, 1, 0], [], []>} : vector<8x4xbf16>, vector<8x4xbf16>, vector<8x8xf32> -> vector<8x8xf32>
    %cst_58 = arith.constant dense<0xFF800000> : vector<8xf32>
    %103 = vector.multi_reduction <maximumf>, %102, %cst_58 [1] : vector<8x8xf32> to vector<8xf32>
    %104 = vector.shape_cast %103 : vector<8xf32> to vector<8x1xf32>
    %105 = vector.broadcast %104 : vector<8x1xf32> to vector<8x8xf32>
    %106 = arith.subf %102, %105 : vector<8x8xf32>
    %107 = math.exp %106 : vector<8x8xf32>
    %cst_59 = arith.constant dense<0.000000e+00> : vector<8xf32>
    %108 = vector.multi_reduction <add>, %107, %cst_59 [1] : vector<8x8xf32> to vector<8xf32>
    %109 = vector.shape_cast %108 : vector<8xf32> to vector<8x1xf32>
    %110 = tpu.reciprocal %109 {approx = true} : vector<8x1xf32> -> vector<8x1xf32>
    %111 = vector.broadcast %110 : vector<8x1xf32> to vector<8x8xf32>
    %112 = arith.mulf %107, %111 : vector<8x8xf32>
    %113 = arith.truncf %112 : vector<8x8xf32> to vector<8x8xbf16>
    %cst_60 = arith.constant dense<0.000000e+00> : vector<8x4xf32>
    %114 = tpu.matmul %113, %101, %cst_60 {dimension_numbers = #tpu.dot_dimension_numbers<[1], [0], [0], [1], [0, 0, 1, 1], [], []>} : vector<8x8xbf16>, vector<8x4xbf16>, vector<8x4xf32> -> vector<8x4xf32>
    %115 = arith.truncf %114 : vector<8x4xf32> to vector<8x4xbf16>
    %c0_61 = arith.constant 0 : index
    %c20_62 = arith.constant 20 : index
    %116 = vector.load %arg8[%c0_61, %c20_62] : memref<8x32xbf16, #tpu.memory_space<vmem>>, vector<8x4xbf16>
    tpu.vector_store %arg8[%c0_61, %c20_62], %115 {strides = array<i32>} : memref<8x32xbf16, #tpu.memory_space<vmem>>, vector<8x4xbf16>,
    %c0_63 = arith.constant 0 : index
    %c24 = arith.constant 24 : index
    %117 = vector.load %arg7[%c0_63, %c24] : memref<8x96xbf16, #tpu.memory_space<vmem>>, vector<8x4xbf16>
    %c0_64 = arith.constant 0 : index
    %c56 = arith.constant 56 : index
    %118 = vector.load %arg7[%c0_64, %c56] : memref<8x96xbf16, #tpu.memory_space<vmem>>, vector<8x4xbf16>
    %c0_65 = arith.constant 0 : index
    %c88 = arith.constant 88 : index
    %119 = vector.load %arg7[%c0_65, %c88] : memref<8x96xbf16, #tpu.memory_space<vmem>>, vector<8x4xbf16>
    %cst_66 = arith.constant dense<0.000000e+00> : vector<8x8xf32>
    %120 = tpu.matmul %117, %118, %cst_66 {dimension_numbers = #tpu.dot_dimension_numbers<[1], [1], [0], [0], [0, 0, 1, 0], [], []>} : vector<8x4xbf16>, vector<8x4xbf16>, vector<8x8xf32> -> vector<8x8xf32>
    %cst_67 = arith.constant dense<0xFF800000> : vector<8xf32>
    %121 = vector.multi_reduction <maximumf>, %120, %cst_67 [1] : vector<8x8xf32> to vector<8xf32>
    %122 = vector.shape_cast %121 : vector<8xf32> to vector<8x1xf32>
    %123 = vector.broadcast %122 : vector<8x1xf32> to vector<8x8xf32>
    %124 = arith.subf %120, %123 : vector<8x8xf32>
    %125 = math.exp %124 : vector<8x8xf32>
    %cst_68 = arith.constant dense<0.000000e+00> : vector<8xf32>
    %126 = vector.multi_reduction <add>, %125, %cst_68 [1] : vector<8x8xf32> to vector<8xf32>
    %127 = vector.shape_cast %126 : vector<8xf32> to vector<8x1xf32>
    %128 = tpu.reciprocal %127 {approx = true} : vector<8x1xf32> -> vector<8x1xf32>
    %129 = vector.broadcast %128 : vector<8x1xf32> to vector<8x8xf32>
    %130 = arith.mulf %125, %129 : vector<8x8xf32>
    %131 = arith.truncf %130 : vector<8x8xf32> to vector<8x8xbf16>
    %cst_69 = arith.constant dense<0.000000e+00> : vector<8x4xf32>
    %132 = tpu.matmul %131, %119, %cst_69 {dimension_numbers = #tpu.dot_dimension_numbers<[1], [0], [0], [1], [0, 0, 1, 1], [], []>} : vector<8x8xbf16>, vector<8x4xbf16>, vector<8x4xf32> -> vector<8x4xf32>
    %133 = arith.truncf %132 : vector<8x4xf32> to vector<8x4xbf16>
    %c0_70 = arith.constant 0 : index
    %c24_71 = arith.constant 24 : index
    %134 = vector.load %arg8[%c0_70, %c24_71] : memref<8x32xbf16, #tpu.memory_space<vmem>>, vector<8x4xbf16>
    tpu.vector_store %arg8[%c0_70, %c24_71], %133 {strides = array<i32>} : memref<8x32xbf16, #tpu.memory_space<vmem>>, vector<8x4xbf16>,
    %c0_72 = arith.constant 0 : index
    %c28 = arith.constant 28 : index
    %135 = vector.load %arg7[%c0_72, %c28] : memref<8x96xbf16, #tpu.memory_space<vmem>>, vector<8x4xbf16>
    %c0_73 = arith.constant 0 : index
    %c60 = arith.constant 60 : index
    %136 = vector.load %arg7[%c0_73, %c60] : memref<8x96xbf16, #tpu.memory_space<vmem>>, vector<8x4xbf16>
    %c0_74 = arith.constant 0 : index
    %c92 = arith.constant 92 : index
    %137 = vector.load %arg7[%c0_74, %c92] : memref<8x96xbf16, #tpu.memory_space<vmem>>, vector<8x4xbf16>
    %cst_75 = arith.constant dense<0.000000e+00> : vector<8x8xf32>
    %138 = tpu.matmul %135, %136, %cst_75 {dimension_numbers = #tpu.dot_dimension_numbers<[1], [1], [0], [0], [0, 0, 1, 0], [], []>} : vector<8x4xbf16>, vector<8x4xbf16>, vector<8x8xf32> -> vector<8x8xf32>
    %cst_76 = arith.constant dense<0xFF800000> : vector<8xf32>
    %139 = vector.multi_reduction <maximumf>, %138, %cst_76 [1] : vector<8x8xf32> to vector<8xf32>
    %140 = vector.shape_cast %139 : vector<8xf32> to vector<8x1xf32>
    %141 = vector.broadcast %140 : vector<8x1xf32> to vector<8x8xf32>
    %142 = arith.subf %138, %141 : vector<8x8xf32>
    %143 = math.exp %142 : vector<8x8xf32>
    %cst_77 = arith.constant dense<0.000000e+00> : vector<8xf32>
    %144 = vector.multi_reduction <add>, %143, %cst_77 [1] : vector<8x8xf32> to vector<8xf32>
    %145 = vector.shape_cast %144 : vector<8xf32> to vector<8x1xf32>
    %146 = tpu.reciprocal %145 {approx = true} : vector<8x1xf32> -> vector<8x1xf32>
    %147 = vector.broadcast %146 : vector<8x1xf32> to vector<8x8xf32>
    %148 = arith.mulf %143, %147 : vector<8x8xf32>
    %149 = arith.truncf %148 : vector<8x8xf32> to vector<8x8xbf16>
    %cst_78 = arith.constant dense<0.000000e+00> : vector<8x4xf32>
    %150 = tpu.matmul %149, %137, %cst_78 {dimension_numbers = #tpu.dot_dimension_numbers<[1], [0], [0], [1], [0, 0, 1, 1], [], []>} : vector<8x8xbf16>, vector<8x4xbf16>, vector<8x4xf32> -> vector<8x4xf32>
    %151 = arith.truncf %150 : vector<8x4xf32> to vector<8x4xbf16>
    %c0_79 = arith.constant 0 : index
    %c28_80 = arith.constant 28 : index
    %152 = vector.load %arg8[%c0_79, %c28_80] : memref<8x32xbf16, #tpu.memory_space<vmem>>, vector<8x4xbf16>
    tpu.vector_store %arg8[%c0_79, %c28_80], %151 {strides = array<i32>} : memref<8x32xbf16, #tpu.memory_space<vmem>>, vector<8x4xbf16>,
    %c0_81 = arith.constant 0 : index
    %c0_82 = arith.constant 0 : index
    %153 = vector.load %arg8[%c0_81, %c0_82] : memref<8x32xbf16, #tpu.memory_space<vmem>>, vector<8x32xbf16>
    %c0_83 = arith.constant 0 : index
    %c0_84 = arith.constant 0 : index
    %154 = vector.load %arg4[%c0_83, %c0_84] : memref<32x32xbf16, #tpu.memory_space<vmem>>, vector<32x32xbf16>
    %cst_85 = arith.constant dense<0.000000e+00> : vector<8x32xf32>
    %155 = tpu.matmul %153, %154, %cst_85 {dimension_numbers = #tpu.dot_dimension_numbers<[1], [0], [0], [1], [0, 0, 1, 1], [], []>} : vector<8x32xbf16>, vector<32x32xbf16>, vector<8x32xf32> -> vector<8x32xf32>
    %c0_86 = arith.constant 0 : index
    %c0_87 = arith.constant 0 : index
    %156 = vector.load %arg5[%c0_86, %c0_87] : memref<1x32xf32, #tpu.memory_space<vmem>>, vector<1x32xf32>
    %157 = vector.broadcast %156 : vector<1x32xf32> to vector<8x32xf32>
    %158 = arith.addf %155, %157 : vector<8x32xf32>
    %c0_88 = arith.constant 0 : index
    %c0_89 = arith.constant 0 : index
    %c0_90 = arith.constant 0 : index
    %159 = vector.load %arg6[%c0_88, %c0_89, %c0_90] : memref<1x8x32xf32, #tpu.memory_space<vmem>>, vector<1x8x32xf32>
    %160 = vector.shape_cast %159 : vector<1x8x32xf32> to vector<8x32xf32>
    %161 = vector.shape_cast %158 : vector<8x32xf32> to vector<1x8x32xf32>
    tpu.vector_store %arg6[%c0_88, %c0_89, %c0_90], %161 {strides = array<i32>} : memref<1x8x32xf32, #tpu.memory_space<vmem>>, vector<1x8x32xf32>,
    return
  }
  func.func @transform_0(%arg0: i32) -> (i32, i32, i32) {
    %c0_i32 = arith.constant 0 : i32
    %c0_i32_0 = arith.constant 0 : i32
    %c0_i32_1 = arith.constant 0 : i32
    return %arg0, %c0_i32, %c0_i32_0 : i32, i32, i32
  }
  func.func @transform_1(%arg0: i32) -> (i32, i32) {
    %c0_i32 = arith.constant 0 : i32
    %c0_i32_0 = arith.constant 0 : i32
    %c0_i32_1 = arith.constant 0 : i32
    return %c0_i32, %c0_i32_0 : i32, i32
  }
  func.func @transform_2(%arg0: i32) -> (i32, i32) {
    %c0_i32 = arith.constant 0 : i32
    %c0_i32_0 = arith.constant 0 : i32
    %c0_i32_1 = arith.constant 0 : i32
    return %c0_i32, %c0_i32_0 : i32, i32
  }
  func.func @transform_3(%arg0: i32) -> (i32, i32) {
    %c0_i32 = arith.constant 0 : i32
    %c0_i32_0 = arith.constant 0 : i32
    %c0_i32_1 = arith.constant 0 : i32
    return %c0_i32, %c0_i32_0 : i32, i32
  }
  func.func @transform_4(%arg0: i32) -> (i32, i32) {
    %c0_i32 = arith.constant 0 : i32
    %c0_i32_0 = arith.constant 0 : i32
    %c0_i32_1 = arith.constant 0 : i32
    return %c0_i32, %c0_i32_0 : i32, i32
  }
  func.func @transform_5(%arg0: i32) -> (i32, i32, i32) {
    %c0_i32 = arith.constant 0 : i32
    %c0_i32_0 = arith.constant 0 : i32
    %c0_i32_1 = arith.constant 0 : i32
    return %arg0, %c0_i32, %c0_i32_0 : i32, i32, i32
  }
}

</mosaic_0001>

<bundles_post_ra>
// kernel: tpu_custom_call.1
= control target key start
LH: loop header
LB: loop body
LE: loop exit
PB: predicated region body
PF: predicated region fallthrough
CT: control target
= control target key end

     0   :  { %10 = vsyncpa [#allocation5], 0  ;;  %s1675_s0 = inlined_call_operand.hbm [shape: bf16[2,8,32], index: 0, kind: input, shape index: {}]   ;;  %s1676_s1 = inlined_call_operand.hbm [shape: bf16[32,96], index: 1, kind: input, shape index: {}]   ;;  %s1677_s2 = inlined_call_operand.vmem [shape: f32[1,96], index: 2, kind: input, shape index: {}]   ;;  %s1678_s3 = inlined_call_operand.hbm [shape: bf16[32,32], index: 3, kind: input, shape index: {}]   ;;  %s1679_s4 = inlined_call_operand.vmem [shape: f32[1,32], index: 4, kind: input, shape index: {}]   ;;  %s1680_s5 = inlined_call_operand.hbm [shape: f32[2,8,32], index: 5, kind: output, shape index: {}]  }
   0x1   :  { %12 = vsyncpa [#allocation5 + $0x1], 0 }
   0x2   :  { %13 = vsyncpa [#allocation8], 0 }
   0x3   :  { %14 = vsyncpa [#allocation6], 0 }
   0x4   :  { %16 = vsyncpa [#allocation6 + $0x1], 0  ;;  %s1406_s18 = smov 0   ;;  %s1408_s19 = smov 0  }
   0x5   :  { %s1410_s20 = smov 0   ;;  %s1412_s21 = smov 0  }
   0x6 LB: > { %s174_s24 = sshll.u32 %s1676_s1, 4  ;;  %s1430_s25 = sadd.s32 4294967295, %s1340_s21   ;;  %s1340_s21 = sphi %s1412_s21, %s1691_s21   ;;  %s1336_s20 = sphi %s1410_s20, %s1690_s20   ;;  %s1332_s19 = sphi %s1408_s19, %s1689_s19   ;;  %s1328_s18 = sphi %s1406_s18, %s1688_s18   ;;  %s175_s24 = int_to_ptr.hbm [resolvable:$true] %s174_s24 }
   0x7   : > { %p994_p0 = scmp.ge.s32.totalorder %s1340_s21, 1  ;;  %p43_p1 = scmp.eq.s32.totalorder %s1430_s25, 0 }
   0x8   : > { %p163_p2 = scmp.lt.s32.totalorder %s1340_s21, 3  ;;  %s1342_s27 = smov [#allocation7]  }
   0x9   : > { %s176_s28 = sshll.u32 %s1342_s27, 4  ;;  %s191_s6 = sshll.u32 %s1678_s3, 4  ;;  %s177_s28 = int_to_ptr.vmem [resolvable:$true] %s176_s28  ;;  %s192_s6 = int_to_ptr.hbm [resolvable:$true] %s191_s6 }
   0xa   : > { %p1435_p3 = pnand %p994_p0, %p163_p2  ;;  %s1343_s7 = smov [#allocation9]  }
   0xb   : > { %s193_s8 = sshll.u32 %s1343_s7, 4  ;;  %s1344_s9 = smov 64   ;;  %s194_s8 = int_to_ptr.vmem [resolvable:$true] %s193_s8 }
   0xc   : > { %p1059_p4 = pneg %p1435_p3  ;;  %s1345_s10 = smov 4  }
   0xd   : > { %s993_s11 = sadd.s32 4294967294, %s1340_s21   ;;  %s1449_s12 = sadd.s32 1, %s1340_s21  }
   0xe   : > { %p1060_p6 = pnand %p1059_p4, %p43_p1  ;;  %s26_s13 = ssub.s32 %s1340_s21, %s1449_s12 }
   0xf   : > { %s29_s14 = sadd.s32 1, %s1336_s20  ;;  %p27_p7 = scmp.eq.s32.totalorder %s26_s13, 0 }
  0x10   : > { %1062 = dma.hbm_to_vmem [thread:$0]  (!%p1060_p6), %s175_s24, 256, %s177_s28, [#allocation8], %s1344_s9, %s1344_s9, %s1345_s10  }
  0x11   : > { %1065 = dma.hbm_to_vmem [thread:$0]  (!%p1060_p6), %s192_s6, 256, %s194_s8, [#allocation8], %s1344_s9, %s1344_s9, %s1345_s10  }
  0x12   : > { %p36_p8 = scmp.ne.s32.totalorder %s1336_s20, %s1332_s19  ;;  %p37_p9 = scmp.eq.s32.totalorder %s1340_s21, 0 }
  0x13   : > { %p42_p10 = scmp.ne.s32.totalorder %s1332_s19, %s1328_s18  ;;  %p150_p13 = scmp.eq.s32.totalorder %s1430_s25, 1 }
  0x14   : > { %s1460_s15 = scalar_select %p27_p7, %s1336_s20, %s29_s14  }
  0x15   : > { %p1462_p11 = por %p37_p9, %p36_p8  ;;  %p1468_p12 = por %p43_p1, %p42_p10 }
  0x16   : > { %p156_p0 = scmp.eq.s32.totalorder %s993_s11, 1  ;;  %p1076_p2 = scmp.lt.s32.totalorder %s1340_s21, 2 }
  0x17   : > { %s210_s22 = sand.u32 1, %s1336_s20   ;;  %p1475_p4 = por %p150_p13, %p36_p8 }
  0x18   : > { %p1479_p6 = por %p156_p0, %p42_p10  ;;  %s998_s27 = sshll.u32 %s210_s22, 2 }
  0x19   : > { %s999_s28 = sshll.u32 %s1340_s21, 2  ;;  %s214_s7 = scalar_lea.vmem [#allocation4], %s998_s27 }
  0x1a   : > { %s218_s6 = scalar_lea.hbm %s1675_s0, %s999_s28  ;;  %s222_s8 = sshll.u32 %s214_s7, 4  ;;  %s223_s8 = int_to_ptr.vmem [resolvable:$true] %s222_s8 }
  0x1b   : > { %s220_s9 = sshll.u32 %s218_s6, 4  ;;  %p1489_p7 = pnand %p1076_p2, %p1462_p11  ;;  %s221_s9 = int_to_ptr.hbm [resolvable:$true] %s220_s9 }
  0x1c   : > { %s211_s11 = scalar_lea.sflag [#allocation5], %s210_s22  ;;  %s1240_s13 = sshra.s32 %s221_s9, 4  ;;  %s1241_s13 = int_to_ptr.hbm [resolvable:$true] %s1240_s13 }
  0x1d   : > { %s1242_s14 = scalar_lea.hbm %s1241_s13, 4  ;;  %p1244_p9 = pneg %p1489_p7 }
  0x1e   : > { %p1243_p8 = scmp.ne.s32.totalorder %s1241_s13, %s1242_s14  ;;  %s1247_s29 = scalar_lea.hbm %s1675_s0, 8 }
  0x1f   : > { %p1248_p11 = scmp.lt.s32.totalorder %s1241_s13, %s1675_s0  ;;  %p1249_p0 = scmp.lt.s32.totalorder %s1247_s29, %s1242_s14 }
  0x20   : > { %p1245_p10 = pnand %p1244_p9, %p1243_p8 }
  0x21   : > { %p1250_p2 = por %p1249_p0, %p1248_p11 }
  0x22   : > { %p1246_p13 = pneg %p1245_p10 }
  0x24   : > { %p1251_p5 = pnand %p1250_p2, %p1246_p13 }
  0x26   : > { %1254 = shalt.err (!%p1251_p5)
}
  0x27   : > { %1069 = dma.hbm_to_vmem [thread:$0]  (!%p1489_p7), %s221_s9, 64, %s223_s8, %s211_s11  }
  0x28   : > { %231 = sbr.rel (%p1435_p3) target bundleno = 1189 (0x4a5), region = 40  ;;  %s1506_s22 = sand.u32 (!%p1435_p3), 1, %s1332_s19  }
  0x29   : > { %s1001_s6 = sshll.u32 (!%p1435_p3), %s1506_s22, 2  ;;  %s234_s7 = scalar_lea.sflag (!%p1435_p3), [#allocation5], %s1506_s22 }
  0x2a   : > { %s237_s27 = scalar_lea.vmem (!%p1435_p3), [#allocation4], %s1001_s6 }
  0x2d   : > { %1315 = dma.done.wait (%p1468_p12), %s234_s7, 64  }
  0x2e   : > { %1317 = vsyncadd (%p1468_p12), %s234_s7, 4294967232 }
  0x2f   : > { %1319 = dma.done.wait (%p43_p1), [#allocation8], 512  }
  0x30   : > { %1321 = vsyncadd (%p43_p1), [#allocation8], 4294966784  ;;  %v1044_v0 = vld [vmem:[#allocation7 + $0x8] sm:$0xff]  ;;  %v1043_v1 = vld [vmem:[#allocation7] sm:$0xff]  ;;  %vm297_vm0 = vcmask 261120   ;;  %vm315_vm1 = vcmask 781312  }
  0x31   : > { %307 = vmatpush.bf16.msra.mxu0 %v1044_v0  ;;  %v276_v2 = vld [vmem:[%s237_s27] sm:$0xf]  ;;  %v1146_v3 = vld [vmem:[%s1677_s2] ss:$0 sm:$0xff]  ;;  %s1346_s17 = smov 116   ;;  %s1347_s9 = smov 124  }
  0x32   : > { %s1348_s10 = smov 96   ;;  %s1349_s11 = smov 88   ;;  %vm323_vm2 = vcmask 31744   ;;  %vm343_vm3 = vcmask 64512   ;;  %vm361_vm4 = vcmask 1043456   ;;  %vm379_vm5 = vcmask 27648  }
  0x33   : > { %s1350_s13 = smov 84   ;;  %s1351_s14 = smov 92   ;;  %vm446_vm6 = vcmask 60448   ;;  %vm513_vm7 = vcmask 93248   ;;  %vm580_vm8 = vcmask 126048   ;;  %vm647_vm9 = vcmask 158848  }
  0x34   : > { %s1352_s28 = smov 108   ;;  %s1353_s29 = smov 120   ;;  %vm714_vm10 = vcmask 191648   ;;  %vm781_vm11 = vcmask 224448   ;;  %vm848_vm12 = vcmask 257248  }
  0x35   : > { %308 = vmatpush.bf16.msra.mxu0 %v1043_v1  ;;  %s1354_s30 = smov 76   ;;  %s1355_s16 = smov 112  }
  0x36   : > { %s1356_s6 = smov 68   ;;  %s1357_s7 = smov 80  }
  0x37   : > { %s1358_s27 = smov 104   ;;  %s1359_s26 = smov 72  }
  0x38   : > { %1013 = vmatmul.msk.bf16.vlgmr.msra.gmra.mxu0 %vm297_vm0, %v276_v2  ;;  %s1360_s8 = smov 100  }
  0xb5   : > { %v310_v4 = vpop.f32.mrf.mxu0 }
  0xb6   : > { %v311_v5 = vadd.f32 %v1146_v3, %v310_v4 }
  0xb8   : > { %v314_v6 = vpack.c.bf16 %v311_v5, %v311_v5 }
  0xba   : > { %316 = vst.msk [vmem:[#allocation2] sm:$0xf] %vm315_vm1, %v314_v6 }
  0xbd   : > { %v312_v7 = vpop.f32.mrf.mxu0 }
  0xc1   : > { %v515_v8 = vld [vmem:[#allocation2] sm:$0xf] }
  0xc2   : > { %v381_v9 = vld [vmem:[#allocation2] sm:$0xf]  ;;  %v517_v11 = vunpack.c.l.b16 %v515_v8 }
  0xc3   : > { %v1522_v10 = vld [vmem:[#allocation2] sm:$0xf]  ;;  %v383_v12 = vunpack.c.l.b16 %v381_v9 }
  0xc4   : > { %v319_v13 = vunpack.c.l.b16 %v1522_v10  ;;  %v1525_v14 = vpack.c.b16 %v517_v11, %v517_v11  ;;  %v448_v17 = vld [vmem:[#allocation2] sm:$0xf] }
  0xc5   : > { %v384_v15 = vpack.c.b16 %v383_v12, %v383_v12  ;;  %v450_v18 = vunpack.c.l.b16 %v448_v17  ;;  %v649_v20 = vld [vmem:[#allocation2] sm:$0xf] }
  0xc6   : > { %v1527_v16 = vpack.c.b16 %v319_v13, %v319_v13  ;;  %519 = vrot.lane.b32.xlu2 %v1525_v14, %s1346_s17  ;;  %v651_v21 = vunpack.c.l.b16 %v649_v20  ;;  %v582_v23 = vld [vmem:[#allocation2] sm:$0xf]  ;;  %s1361_s17 = smov 60  }
  0xc7   : > { %385 = vrot.lane.b32.xlu1 %v384_v15, %s1347_s9  ;;  %v1531_v19 = vpack.c.b16 %v450_v18, %v450_v18  ;;  %v783_v24 = vld [vmem:[#allocation2] sm:$0xf]  ;;  %v584_v25 = vunpack.c.l.b16 %v582_v23  ;;  %s1362_s9 = smov 64  }
  0xc8   : > { %321 = vrot.lane.b32.xlu0 %v1527_v16, %s1348_s10  ;;  %v1535_v22 = vpack.c.b16 %v651_v21, %v651_v21  ;;  %v785_v26 = vunpack.c.l.b16 %v783_v24  ;;  %v716_v29 = vld [vmem:[#allocation2] sm:$0xf]  ;;  %s1363_s10 = smov 52  }
  0xc9   : > { %v1540_v27 = vpack.c.b16 %v584_v25, %v584_v25  ;;  %v718_v30 = vunpack.c.l.b16 %v716_v29 }
  0xca   : > { %v1542_v28 = vpack.c.b16 %v785_v26, %v785_v26 }
  0xcb   : > { %v1547_v31 = vpack.c.b16 %v718_v30, %v718_v30 }
  0xce   : > { %454 = vrot.lane.b32.xlu2 %v1531_v19, %s1349_s11  ;;  %s1364_s11 = smov 44  }
  0xcf   : > { %521 = vrot.lane.b32.xlu1 %v1525_v14, %s1350_s13  ;;  %s1365_s13 = smov 48  }
  0xd0   : > { %387 = vrot.lane.b32.xlu0 %v384_v15, %s1351_s14  ;;  %s1366_s14 = smov 56  }
  0xd6   : > { %653 = vrot.lane.b32.xlu2 %v1535_v22, %s1352_s28  ;;  %s1367_s28 = smov 36  }
  0xd7   : > { %452 = vrot.lane.b32.xlu1 %v1531_v19, %s1353_s29  ;;  %s1368_s29 = smov 40  }
  0xd8   : > { %655 = vrot.lane.b32.xlu0 %v1535_v22, %s1354_s30  ;;  %s1369_s30 = smov 8  }
  0xde   : > { %586 = vrot.lane.b32.xlu2 %v1540_v27, %s1355_s16  ;;  %s1370_s16 = smov 4  }
  0xdf   : > { %789 = vrot.lane.b32.xlu1 %v1542_v28, %s1356_s6  ;;  %s1371_s6 = smov 16  }
  0xe0   : > { %588 = vrot.lane.b32.xlu0 %v1540_v27, %s1357_s7  ;;  %s1372_s7 = smov 12  }
  0xe6   : > { %720 = vrot.lane.b32.xlu2 %v1547_v31, %s1358_s27  ;;  %s1373_s27 = smov 24  }
  0xe7   : > { %722 = vrot.lane.b32.xlu1 %v1547_v31, %s1359_s26  ;;  %s1374_s26 = smov 20  }
  0xe8   : > { %787 = vrot.lane.b32.xlu0 %v1542_v28, %s1360_s8  ;;  %s1375_s8 = smov 28  }
  0xee   : > { %420 = vrot.lane.b32.xlu2 %v384_v15, %s1361_s17  ;;  %s1040_s17 = sshll.u32 %s1430_s25, 3  ;;  %s889_s25 = scalar_lea.sflag [#allocation6], %s1506_s22 }
 0x120   : > { %v520_v32 = vpop.permute.xlu2 %519 }
 0x128   : > { %v455_v33 = vpop.permute.xlu2 %454 }
 0x129   : > { %v460_v34 = vsel %vm323_vm2, %v455_v33, 0 }
 0x12a   : > { %469 = vmatpush.bf16.xpose.msrb.mxu0 %v460_v34 }
 0x130   : > { %v654_v45 = vpop.permute.xlu2 %653 }
 0x138   : > { %v587_v50 = vpop.permute.xlu2 %586 }
 0x139   : > { %v386_v35 = vpop.permute.xlu1 %385 }
 0x13a   : > { %v322_v36 = vpop.permute.xlu0 %321 }
 0x13b   : > { %v328_v37 = vsel %vm323_vm2, %v322_v36, 0 }
 0x13c   : > { %337 = vmatpush.bf16.xpose.msra.mxu1 %v328_v37 }
 0x140   : > { %v721_v53 = vpop.permute.xlu2 %720 }
 0x141   : > { %v522_v38 = vpop.permute.xlu1 %521 }
 0x142   : > { %v388_v39 = vpop.permute.xlu0 %387  ;;  %v527_v40 = vsel %vm323_vm2, %v522_v38, 0 }
 0x143   : > { %1014 = vmatmul.msk.bf16.vlgmr.msra.gmra.mxu1 %vm323_vm2, %v1522_v10  ;;  %v393_v41 = vsel %vm323_vm2, %v388_v39, 0 }
 0x144   : > { %402 = vmatpush.bf16.xpose.msra.mxu3 %v393_v41 }
 0x149   : > { %v453_v42 = vpop.permute.xlu1 %452 }
 0x14a   : > { %v656_v43 = vpop.permute.xlu0 %655  ;;  %1018 = vmatmul.msk.bf16.vlgmr.msrb.gmra.mxu0 %vm323_vm2, %v453_v42 }
 0x14b   : > { %v661_v44 = vsel %vm323_vm2, %v656_v43, 0  ;;  %1016 = vmatmul.msk.bf16.vlgmr.msra.gmra.mxu3 %vm323_vm2, %v386_v35 }
 0x14c   : > { %536 = vmatpush.bf16.xpose.msrb.mxu3 %v527_v40 }
 0x151   : > { %v790_v46 = vpop.permute.xlu1 %789 }
 0x152   : > { %v589_v47 = vpop.permute.xlu0 %588  ;;  %v795_v52 = vsel %vm323_vm2, %v790_v46, 0 }
 0x153   : > { %v594_v48 = vsel %vm323_vm2, %v589_v47, 0 }
 0x154   : > { %670 = vmatpush.bf16.xpose.msra.mxu3 %v661_v44  ;;  %603 = vmatpush.bf16.xpose.msra.mxu0 %v594_v48 }
 0x159   : > { %v723_v49 = vpop.permute.xlu1 %722 }
 0x15a   : > { %v728_v51 = vsel %vm323_vm2, %v723_v49, 0  ;;  %v788_v54 = vpop.permute.xlu0 %787 }
 0x15b   : > { %1020 = vmatmul.msk.bf16.vlgmr.msrb.gmra.mxu3 %vm323_vm2, %v520_v32  ;;  %1022 = vmatmul.msk.bf16.vlgmr.msra.gmra.mxu0 %vm323_vm2, %v587_v50 }
 0x15c   : > { %804 = vmatpush.bf16.xpose.msrb.mxu3 %v795_v52  ;;  %737 = vmatpush.bf16.xpose.msrb.mxu0 %v728_v51 }
 0x16b   : > { %1024 = vmatmul.msk.bf16.vlgmr.msra.gmra.mxu3 %vm323_vm2, %v654_v45  ;;  %1026 = vmatmul.msk.bf16.vlgmr.msrb.gmra.mxu0 %vm323_vm2, %v721_v53 }
 0x17b   : > { %1028 = vmatmul.msk.bf16.vlgmr.msrb.gmra.mxu3 %vm323_vm2, %v788_v54 }
 0x1c0   : > { %v339_v55 = vpop.f32.mrf.mxu1 }
 0x1c1   : > { %v344_v56 = vsel %vm343_vm3, %v339_v55, -inf }
 0x1c2   : > { %345 = vmax.xlane.f32.xlu0 %v344_v56 }
 0x1c7   : > { %v471_v57 = vpop.f32.mrf.mxu0 }
 0x1c8   : > { %v341_v58 = vpop.f32.mrf.mxu1  ;;  %v475_v59 = vsel %vm343_vm3, %v471_v57, -inf }
 0x1c9   : > { %476 = vmax.xlane.f32.xlu2 %v475_v59 }
 0x1ce   : > { %v404_v60 = vpop.f32.mrf.mxu3 }
 0x1cf   : > { %v473_v61 = vpop.f32.mrf.mxu0  ;;  %v408_v62 = vsel %vm343_vm3, %v404_v60, -inf }
 0x1d0   : > { %409 = vmax.xlane.f32.xlu1 %v408_v62 }
 0x1d6   : > { %356 = vrot.lane.b32.xlu0 %v1527_v16, %s1362_s9  ;;  %v406_v63 = vpop.f32.mrf.mxu3  ;;  %v421_v16 = vpop.permute.xlu2 %420  ;;  %s1004_s9 = sshll.u32 %s1506_s22, 3 }
 0x1d7   : > { %v426_v37 = vsel %vm361_vm4, %v421_v16, 0 }
 0x1d8   : > { %v605_v0 = vpop.f32.mrf.mxu0 }
 0x1d9   : > { %v609_v1 = vsel %vm343_vm3, %v605_v0, -inf }
 0x1da   : > { %610 = vmax.xlane.f32.xlu2 %v609_v1 }
 0x1de   : > { %v538_v2 = vpop.f32.mrf.mxu3 }
 0x1df   : > { %v542_v4 = vsel %vm343_vm3, %v538_v2, -inf }
 0x1e0   : > { %v607_v3 = vpop.f32.mrf.mxu0 }
 0x1e2   : > { %543 = vmax.xlane.f32.xlu2 %v542_v4 }
 0x1e6   : > { %v540_v5 = vpop.f32.mrf.mxu3 }
 0x1e8   : > { %v739_v6 = vpop.f32.mrf.mxu0 }
 0x1e9   : > { %v743_v7 = vsel %vm343_vm3, %v739_v6, -inf }
 0x1ea   : > { %744 = vmax.xlane.f32.xlu1 %v743_v7 }
 0x1ee   : > { %v672_v8 = vpop.f32.mrf.mxu3 }
 0x1ef   : > { %v676_v12 = vsel %vm343_vm3, %v672_v8, -inf }
 0x1f0   : > { %v741_v9 = vpop.f32.mrf.mxu0 }
 0x1f6   : > { %v674_v10 = vpop.f32.mrf.mxu3 }
 0x1fe   : > { %v1576_v11 = vpop.f32.mrf.mxu3 }
 0x1ff   : > { %v810_v13 = vsel %vm343_vm3, %v1576_v11, -inf }
 0x200   : > { %677 = vmax.xlane.f32.xlu0 %v676_v12  ;;  %811 = vmax.xlane.f32.xlu1 %v810_v13 }
 0x206   : > { %v808_v15 = vpop.f32.mrf.mxu3 }
 0x235   : > { %v346_v17 = vpop.xlane.xlu0 %345 }
 0x236   : > { %v347_v18 = vsub.f32 %v339_v55, %v346_v17 }
 0x238   : > { %v348_v20 = vmul.f32 1.442695, %v347_v18 }
 0x23a   : > { %1148 = vpow2.f32 %v348_v20 }
 0x23c   : > { %v477_v21 = vpop.xlane.xlu2 %476 }
 0x23d   : > { %v478_v23 = vsub.f32 %v471_v57, %v477_v21 }
 0x23f   : > { %v479_v24 = vmul.f32 1.442695, %v478_v23 }
 0x240   : > { %v1581_v25 = vpop.eup %1148 }
 0x241   : > { %1150 = vpow2.f32 %v479_v24  ;;  %v350_v26 = vsel %vm343_vm3, %v1581_v25, 0.0 }
 0x242   : > { %351 = vadd.xlane.f32.xlu1 %v350_v26 }
 0x243   : > { %v410_v29 = vpop.xlane.xlu1 %409 }
 0x244   : > { %v411_v30 = vsub.f32 %v404_v60, %v410_v29 }
 0x246   : > { %v412_v32 = vmul.f32 1.442695, %v411_v30 }
 0x247   : > { %v1585_v33 = vpop.eup %1150 }
 0x248   : > { %1152 = vpow2.f32 %v412_v32  ;;  %v357_v34 = vpop.permute.xlu0 %356  ;;  %v481_v35 = vsel %vm343_vm3, %v1585_v33, 0.0 }
 0x249   : > { %482 = vadd.xlane.f32.xlu0 %v481_v35  ;;  %v363_v36 = vsel %vm361_vm4, %v357_v34, 0 }
 0x24a   : > { %372 = vmatpush.bf16.msra.mxu2 %v363_v36 }
 0x24d   : > { %v611_v40 = vpop.xlane.xlu2 %610 }
 0x24e   : > { %435 = vmatpush.bf16.msrb.mxu2 %v426_v37  ;;  %v1591_v38 = vpop.eup %1152  ;;  %v612_v41 = vsub.f32 %v605_v0, %v611_v40 }
 0x24f   : > { %v414_v39 = vsel %vm343_vm3, %v1591_v38, 0.0 }
 0x250   : > { %415 = vadd.xlane.f32.xlu2 %v414_v39  ;;  %v613_v42 = vmul.f32 1.442695, %v612_v41 }
 0x252   : > { %1154 = vpow2.f32 %v613_v42 }
 0x255   : > { %v544_v43 = vpop.xlane.xlu2 %543 }
 0x256   : > { %v545_v45 = vsub.f32 %v538_v2, %v544_v43 }
 0x258   : > { %v546_v48 = vmul.f32 1.442695, %v545_v45  ;;  %v1155_v49 = vpop.eup %1154 }
 0x25a   : > { %1156 = vpow2.f32 %v546_v48 }
 0x25b   : > { %554 = vrot.lane.b32.xlu1 %v1525_v14, %s1363_s10 }
 0x25d   : > { %688 = vrot.lane.b32.xlu0 %v1535_v22, %s1364_s11  ;;  %v745_v44 = vpop.xlane.xlu1 %744 }
 0x25e   : > { %v746_v47 = vsub.f32 %v739_v6, %v745_v44 }
 0x260   : > { %v747_v50 = vmul.f32 1.442695, %v746_v47  ;;  %v1157_v52 = vpop.eup %1156 }
 0x261   : > { %v548_v55 = vsel %vm343_vm3, %v1157_v52, 0.0 }
 0x262   : > { %1158 = vpow2.f32 %v747_v50 }
 0x265   : > { %621 = vrot.lane.b32.xlu0 %v1540_v27, %s1365_s13  ;;  %v615_v27 = vsel %vm343_vm3, %v1155_v49, 0.0  ;;  %s899_s13 = scalar_lea.hbm %s1680_s5, %s1040_s17 }
 0x268   : > { %487 = vrot.lane.b32.xlu2 %v1531_v19, %s1366_s14  ;;  %v1601_v53 = vpop.eup %1158 }
 0x269   : > { %v749_v57 = vsel %vm343_vm3, %v1601_v53, 0.0 }
 0x273   : > { %v678_v46 = vpop.xlane.xlu0 %677  ;;  %v812_v51 = vpop.xlane.xlu1 %811 }
 0x274   : > { %v679_v14 = vsub.f32 %v672_v8, %v678_v46  ;;  %v813_v19 = vsub.f32 %v1576_v11, %v812_v51 }
 0x276   : > { %v680_v22 = vmul.f32 1.442695, %v679_v14  ;;  %v814_v54 = vmul.f32 1.442695, %v813_v19 }
 0x278   : > { %1160 = vpow2.f32 %v680_v22 }
 0x279   : > { %1162 = vpow2.f32 %v814_v54 }
 0x27e   : > { %v1604_v56 = vpop.eup %1160 }
 0x27f   : > { %v682_v58 = vsel %vm343_vm3, %v1604_v56, 0.0  ;;  %v1610_v59 = vpop.eup %1162 }
 0x280   : > { %v816_v60 = vsel %vm343_vm3, %v1610_v59, 0.0 }
 0x285   : > { %616 = vadd.xlane.f32.xlu1 %v615_v27 }
 0x28d   : > { %549 = vadd.xlane.f32.xlu1 %v548_v55 }
 0x28f   : > { %750 = vadd.xlane.f32.xlu0 %v749_v57 }
 0x291   : > { %683 = vadd.xlane.f32.xlu2 %v682_v58 }
 0x299   : > { %817 = vadd.xlane.f32.xlu2 %v816_v60 }
 0x2a6   : > { %822 = vrot.lane.b32.xlu1 %v1542_v28, %s1367_s28 }
 0x2b1   : > { %755 = vrot.lane.b32.xlu2 %v1547_v31, %s1368_s29  ;;  %s274_s29 = scalar_lea.vmem [#allocation10], %s1004_s9 }
 0x2b5   : > { %v352_v61 = vpop.xlane.xlu1 %351 }
 0x2b6   : > { %1164 = vrcp.f32 %v352_v61 }
 0x2bc   : > { %v1165_v62 = vpop.eup %1164  ;;  %v483_v0 = vpop.xlane.xlu0 %482 }
 0x2bd   : > { %v354_v63 = vmul.f32 %v1165_v62, %v1581_v25  ;;  %1166 = vrcp.f32 %v483_v0 }
 0x2bf   : > { %v355_v1 = vpack.c.bf16 %v354_v63, %v354_v63 }
 0x2c1   : > { %1015 = vmatmul.msk.bf16.vlgmr.msra.gmra.mxu2 %vm343_vm3, %v355_v1 }
 0x2c3   : > { %v416_v2 = vpop.xlane.xlu2 %415  ;;  %v1167_v3 = vpop.eup %1166 }
 0x2c4   : > { %1168 = vrcp.f32 %v416_v2  ;;  %v485_v5 = vmul.f32 %v1167_v3, %v1585_v33  ;;  %v1046_v3 = vld [vmem:[#allocation9 + $0x8] sm:$0xff] }
 0x2c5   : > { %880 = vmatpush.bf16.msra.mxu0 %v1046_v3 }
 0x2c6   : > { %v486_v9 = vpack.c.bf16 %v485_v5, %v485_v5 }
 0x2ca   : > { %v1169_v4 = vpop.eup %1168 }
 0x2cb   : > { %v418_v28 = vmul.f32 %v1169_v4, %v1591_v38  ;;  %v488_v6 = vpop.permute.xlu2 %487  ;;  %v1045_v4 = vld [vmem:[#allocation9] sm:$0xff] }
 0x2cc   : > { %v493_v31 = vsel %vm361_vm4, %v488_v6, 0  ;;  %881 = vmatpush.bf16.msra.mxu0 %v1045_v4 }
 0x2cd   : > { %502 = vmatpush.bf16.msrb.mxu1 %v493_v31  ;;  %v555_v7 = vpop.permute.xlu1 %554  ;;  %v419_v11 = vpack.c.bf16 %v418_v28, %v418_v28 }
 0x2ce   : > { %v560_v8 = vsel %vm361_vm4, %v555_v7, 0 }
 0x2cf   : > { %569 = vmatpush.bf16.msra.mxu2 %v560_v8  ;;  %v689_v10 = vpop.permute.xlu0 %688 }
 0x2d0   : > { %1019 = vmatmul.msk.bf16.vlgmr.msrb.gmra.mxu1 %vm343_vm3, %v486_v9  ;;  %v694_v12 = vsel %vm361_vm4, %v689_v10, 0  ;;  %v1147_v9 = vld [vmem:[%s1679_s4] ss:$0 sm:$0xff] }
 0x2d1   : > { %1017 = vmatmul.msk.bf16.vlgmr.msrb.gmra.mxu2 %vm343_vm3, %v419_v11 }
 0x2d3   : > { %703 = vmatpush.bf16.msrb.mxu2 %v694_v12 }
 0x2d7   : > { %v622_v13 = vpop.permute.xlu0 %621 }
 0x2d8   : > { %v627_v15 = vsel %vm361_vm4, %v622_v13, 0 }
 0x2d9   : > { %636 = vmatpush.bf16.msra.mxu1 %v627_v15 }
 0x2f8   : > { %v617_v16 = vpop.xlane.xlu1 %616 }
 0x2f9   : > { %1170 = vrcp.f32 %v617_v16 }
 0x2ff   : > { %v1171_v17 = vpop.eup %1170 }
 0x300   : > { %v619_v18 = vmul.f32 %v1171_v17, %v1155_v49  ;;  %v550_v20 = vpop.xlane.xlu1 %549 }
 0x301   : > { %1172 = vrcp.f32 %v550_v20 }
 0x302   : > { %v620_v21 = vpack.c.bf16 %v619_v18, %v619_v18  ;;  %v751_v25 = vpop.xlane.xlu0 %750 }
 0x303   : > { %1174 = vrcp.f32 %v751_v25 }
 0x304   : > { %v684_v23 = vpop.xlane.xlu2 %683  ;;  %1023 = vmatmul.msk.bf16.vlgmr.msra.gmra.mxu1 %vm343_vm3, %v620_v21 }
 0x305   : > { %1176 = vrcp.f32 %v684_v23 }
 0x307   : > { %v1173_v24 = vpop.eup %1172 }
 0x308   : > { %v552_v26 = vmul.f32 %v1173_v24, %v1157_v52 }
 0x309   : > { %v1175_v32 = vpop.eup %1174 }
 0x30a   : > { %v553_v29 = vpack.c.bf16 %v552_v26, %v552_v26  ;;  %v753_v34 = vmul.f32 %v1175_v32, %v1601_v53 }
 0x30b   : > { %v1177_v33 = vpop.eup %1176 }
 0x30c   : > { %1021 = vmatmul.msk.bf16.vlgmr.msra.gmra.mxu2 %vm343_vm3, %v553_v29  ;;  %v818_v30 = vpop.xlane.xlu2 %817  ;;  %v686_v37 = vmul.f32 %v1177_v33, %v1604_v56  ;;  %v754_v38 = vpack.c.bf16 %v753_v34, %v753_v34 }
 0x30d   : > { %1178 = vrcp.f32 %v818_v30 }
 0x30e   : > { %v687_v41 = vpack.c.bf16 %v686_v37, %v686_v37 }
 0x313   : > { %v1179_v42 = vpop.eup %1178 }
 0x314   : > { %v756_v35 = vpop.permute.xlu2 %755  ;;  %v820_v43 = vmul.f32 %v1179_v42, %v1610_v59 }
 0x315   : > { %v761_v36 = vsel %vm361_vm4, %v756_v35, 0 }
 0x316   : > { %770 = vmatpush.bf16.msrb.mxu1 %v761_v36  ;;  %v821_v44 = vpack.c.bf16 %v820_v43, %v820_v43 }
 0x318   : > { %v823_v39 = vpop.permute.xlu1 %822 }
 0x319   : > { %v828_v40 = vsel %vm361_vm4, %v823_v39, 0  ;;  %1027 = vmatmul.msk.bf16.vlgmr.msrb.gmra.mxu1 %vm343_vm3, %v754_v38 }
 0x31a   : > { %837 = vmatpush.bf16.msra.mxu2 %v828_v40 }
 0x31c   : > { %1025 = vmatmul.msk.bf16.vlgmr.msrb.gmra.mxu2 %vm343_vm3, %v687_v41 }
 0x32c   : > { %1029 = vmatmul.msk.bf16.vlgmr.msra.gmra.mxu2 %vm343_vm3, %v821_v44 }
 0x344   : > { %v374_v45 = vpop.f32.mrf.mxu2 }
 0x345   : > { %v378_v46 = vpack.c.bf16 %v374_v45, %v374_v45 }
 0x347   : > { %380 = vst.msk [vmem:[#allocation3] sm:$0xf] %vm379_vm5, %v378_v46 }
 0x34c   : > { %v376_v47 = vpop.f32.mrf.mxu2 }
 0x34d   : > { %v504_v48 = vpop.f32.mrf.mxu1 }
 0x34e   : > { %v508_v14 = vpack.c.bf16 %v504_v48, %v504_v48 }
 0x350   : > { %510 = vrot.lane.b32.xlu2 %v508_v14, %s1369_s30  ;;  %s901_s30 = sshll.u32 %s274_s29, 4  ;;  %s902_s30 = int_to_ptr.vmem [resolvable:$true] %s901_s30 }
 0x354   : > { %v437_v49 = vpop.f32.mrf.mxu2 }
 0x355   : > { %v441_v50 = vpack.c.bf16 %v437_v49, %v437_v49  ;;  %v506_v22 = vpop.f32.mrf.mxu1 }
 0x357   : > { %443 = vrot.lane.b32.xlu1 %v441_v50, %s1370_s16  ;;  %s903_s16 = sshll.u32 %s899_s13, 4  ;;  %s904_s16 = int_to_ptr.hbm [resolvable:$true] %s903_s16 }
 0x35c   : > { %v439_v51 = vpop.f32.mrf.mxu2 }
 0x381   : > { %v638_v27 = vpop.f32.mrf.mxu1 }
 0x382   : > { %v642_v19 = vpack.c.bf16 %v638_v27, %v638_v27 }
 0x384   : > { %644 = vrot.lane.b32.xlu2 %v642_v19, %s1371_s6  ;;  %s1284_s6 = sshra.s32 %s904_s16, 4  ;;  %s1285_s6 = int_to_ptr.hbm [resolvable:$true] %s1284_s6 }
 0x385   : > { %p1291_p12 = scmp.lt.s32.totalorder %s1285_s6, %s1680_s5 }
 0x389   : > { %v640_v52 = vpop.f32.mrf.mxu1 }
 0x38f   : > { %v571_v53 = vpop.f32.mrf.mxu2 }
 0x390   : > { %v575_v54 = vpack.c.bf16 %v571_v53, %v571_v53 }
 0x392   : > { %577 = vrot.lane.b32.xlu1 %v575_v54, %s1372_s7  ;;  %s1286_s7 = scalar_lea.hbm %s1285_s6, 8 }
 0x393   : > { %p1287_p1 = scmp.ne.s32.totalorder %s1285_s6, %s1286_s7 }
 0x395   : > { %p1288_p3 = pnand %p1287_p1, %p1475_p4 }
 0x396   : > { %v772_v55 = vpop.f32.mrf.mxu1 }
 0x397   : > { %v776_v56 = vpack.c.bf16 %v772_v55, %v772_v55  ;;  %v573_v57 = vpop.f32.mrf.mxu2  ;;  %p1289_p5 = pneg %p1288_p3 }
 0x39a   : > { %778 = vrot.lane.b32.xlu1 %v776_v56, %s1373_s27 }
 0x39e   : > { %v774_v58 = vpop.f32.mrf.mxu1 }
 0x39f   : > { %v705_v59 = vpop.f32.mrf.mxu2 }
 0x3a0   : > { %v709_v60 = vpack.c.bf16 %v705_v59, %v705_v59 }
 0x3a2   : > { %711 = vrot.lane.b32.xlu0 %v709_v60, %s1374_s26 }
 0x3a7   : > { %v707_v61 = vpop.f32.mrf.mxu2 }
 0x3aa   : > { %v511_v2 = vpop.permute.xlu2 %510 }
 0x3af   : > { %v839_v62 = vpop.f32.mrf.mxu2 }
 0x3b0   : > { %v843_v63 = vpack.c.bf16 %v839_v62, %v839_v62 }
 0x3b2   : > { %845 = vrot.lane.b32.xlu2 %v843_v63, %s1375_s8  ;;  %s1290_s8 = scalar_lea.hbm %s1680_s5, 16 }
 0x3b3   : > { %p1292_p7 = scmp.lt.s32.totalorder %s1290_s8, %s1286_s7 }
 0x3b5   : > { %p1293_p8 = por %p1292_p7, %p1291_p12 }
 0x3b7   : > { %v841_v0 = vpop.f32.mrf.mxu2  ;;  %p1294_p9 = pnand %p1293_p8, %p1289_p5 }
 0x3c9   : > { %v444_v1 = vpop.permute.xlu1 %443 }
 0x3ca   : > { %447 = vst.msk [vmem:[#allocation3] sm:$0xf] %vm446_vm6, %v444_v1 }
 0x3cb   : > { %514 = vst.msk [vmem:[#allocation3] sm:$0xf] %vm513_vm7, %v511_v2 }
 0x3de   : > { %v645_v28 = vpop.permute.xlu2 %644 }
 0x404   : > { %v578_v5 = vpop.permute.xlu1 %577 }
 0x405   : > { %581 = vst.msk [vmem:[#allocation3] sm:$0xf] %vm580_vm8, %v578_v5 }
 0x406   : > { %648 = vst.msk [vmem:[#allocation3] sm:$0xf] %vm647_vm9, %v645_v28 }
 0x40c   : > { %v779_v31 = vpop.permute.xlu1 %778  ;;  %v846_v7 = vpop.permute.xlu2 %845 }
 0x414   : > { %v712_v6 = vpop.permute.xlu0 %711 }
 0x415   : > { %715 = vst.msk [vmem:[#allocation3] sm:$0xf] %vm714_vm10, %v712_v6 }
 0x416   : > { %782 = vst.msk [vmem:[#allocation3] sm:$0xf] %vm781_vm11, %v779_v31 }
 0x417   : > { %849 = vst.msk [vmem:[#allocation3] sm:$0xf] %vm848_vm12, %v846_v7 }
 0x41e   : > { %v850_v8 = vld [vmem:[#allocation3] sm:$0xf] }
 0x41f   : > { %1038 = vmatmul.msk.bf16.vlgmr.msra.gmra.mxu0 %vm297_vm0, %v850_v8 }
 0x49c   : > { %v883_v10 = vpop.f32.mrf.mxu0 }
 0x49d   : > { %v884_v11 = vadd.f32 %v1147_v9, %v883_v10 }
 0x49f   : > { %887 = vst.msk [vmem:[%s274_s29] sm:$0xff] %vm297_vm0, %v884_v11 }
 0x4a0   : > { %1297 = shalt.err (!%p1294_p9)
}
 0x4a1   : > { %1057 = dma.vmem_to_hbm [thread:$0]  (%p1475_p4), %s902_s30, 128, %s904_s16, %s889_s25  }
 0x4a4   : > { %v885_v12 = vpop.f32.mrf.mxu0 }
 0x4a5 PF: > { %s915_s22 = sand.u32 1, %s1328_s18   ;;  %p1687_p10 = scmp.ge.s32.totalorder %s1340_s21, 2 }
 0x4a6   : > { %s916_s10 = scalar_lea.sflag [#allocation6], %s915_s22 }
 0x4a7   : > { %p1071_p13 = pnand %p1687_p10, %p1479_p6 }
 0x4a9   : > { %p1072_p11 = pneg %p1071_p13 }
 0x4ab   : > { %1323 = dma.done.wait (%p1072_p11), %s916_s10, 128  }
 0x4ac   : > { %1325 = vsyncadd (%p1072_p11), %s916_s10, 4294967168  ;;  %p19_p0 = scmp.ge.s32.totalorder %s1449_s12, 4   ;;  %s1688_s18 = smov %s1332_s19 }
 0x4ad   : > { %s1689_s19 = smov %s1336_s20  ;;  %s1690_s20 = smov %s1460_s15 }
 0x4ae   : > { %s1691_s21 = smov %s1449_s12  ;;  %21 = sbr.rel (!%p19_p0) target bundleno = 6 (0x6), region = 93 }
 0x4b3   :  { %922 = vsyncpa [#allocation5], 1 }
 0x4b4   :  { %924 = vsyncpa [#allocation5 + $0x1], 1 }
 0x4b5   :  { %925 = vsyncpa [#allocation8], 1 }
 0x4b6   :  { %926 = vsyncpa [#allocation6], 1 }
 0x4b7   :  { %928 = vsyncpa [#allocation6 + $0x1], 1 }

</bundles_post_ra>
